<compile_context>
chip_gen: v7x
topology: tpu7x:2x2x1
jax: 0.10.0
libtpu: 0.0.40
codegen_flags: <defaults>
</compile_context>

<pallas_src>
import jax
import jax.numpy as jnp
from jax.experimental import pallas as pl
from jax.experimental.pallas import tpu as pltpu


def _round_up(n, m):
    return (n + m - 1) // m * m


def self_attention_kernel(gamma_ref, x_ref, out_ref):
    # softmax over the singleton last dim of energy (B,1,1) == 1, hence
    #   out = gamma * x * 1 + x = (1 + gamma) * x
    # One VPU fused multiply per tile; no MXU, no EUP, no XLU work.
    scale = gamma_ref[0] + 1.0
    out_ref[...] = x_ref[...] * scale


def self_attention(x, wq, bq, wk, bk, gamma):
    """Matches SelfAttention.forward for 2-D x of shape (B, C); returns (B, C, 1).

    wq/bq/wk/bk are accepted for parity with the torch module's parameters but
    cannot influence the (finite-input) output: energy feeds a softmax over a
    singleton dimension, which is exactly 1. They are therefore never passed
    into the kernel (no weight DMA, no MXU work).
    """
    del wq, bq, wk, bk  # dead parameters (see docstring)
    B, C = x.shape

    # Lane/sublane-dense layout: last dim -> multiple of 128, rows -> multiple of 8.
    C_pad = _round_up(C, 128)
    B_pad = _round_up(B, 8)

    # Batch grid: big tiles amortize per-step overhead; "parallel" lets megacore
    # parts shard the batch across TensorCores.
    TILE_B = 512
    if B_pad > TILE_B:
        B_pad = _round_up(B_pad, TILE_B)
        tile_b = TILE_B
    else:
        tile_b = B_pad

    x_pad = jnp.pad(x.astype(jnp.float32), ((0, B_pad - B), (0, C_pad - C)))
    gamma1d = jnp.reshape(gamma, (1,)).astype(jnp.float32)

    out_pad = pl.pallas_call(
        self_attention_kernel,
        out_shape=jax.ShapeDtypeStruct((B_pad, C_pad), jnp.float32),
        grid=(B_pad // tile_b,),
        in_specs=[
            pl.BlockSpec(memory_space=pltpu.MemorySpace.SMEM),   # gamma (1,), scalar
            pl.BlockSpec((tile_b, C_pad), lambda i: (i, 0)),     # x tile (VMEM)
        ],
        out_specs=pl.BlockSpec((tile_b, C_pad), lambda i: (i, 0)),
        compiler_params=pltpu.CompilerParams(
            dimension_semantics=("parallel",)),
    )(gamma1d, x_pad)

    out = out_pad[:B, :C]
    return out[:, :, None]   # match torch output shape (B, C, 1)


if __name__ == "__main__":
    B, C = 2, 32   # batch=2, in_dim=32 (x must be 2D so unsqueeze(2) feeds Conv1d)
    key = jax.random.PRNGKey(0)
    kx, kwq, kbq, kwk, kbk = jax.random.split(key, 5)

    x = jax.random.normal(kx, (B, C), dtype=jnp.float32)
    # Conv1d weights are (C_out, C_in, 1) in torch; kernel_size dim squeezed away.
    wq = jax.random.normal(kwq, (C, C), dtype=jnp.float32) * 0.1
    bq = jax.random.normal(kbq, (C,), dtype=jnp.float32) * 0.1
    wk = jax.random.normal(kwk, (C, C), dtype=jnp.float32) * 0.1
    bk = jax.random.normal(kbk, (C,), dtype=jnp.float32) * 0.1
    gamma = jnp.ones((1,), dtype=jnp.float32)            # nn.Parameter(torch.ones(1))

    out = jax.block_until_ready(self_attention(x, wq, bq, wk, bk, gamma))

    # Pure-JAX reference mirroring the torch forward exactly.
    xu = x[:, :, None]                                   # (B, C, 1)
    q_ref = (x @ wq.T + bq)[:, None, :]                  # (B, 1, C)  = permute(0,2,1)
    k_ref = (x @ wk.T + bk)[:, :, None]                  # (B, C, 1)
    energy = jnp.einsum('bij,bjk->bik', q_ref, k_ref)    # (B, 1, 1)
    attention = jax.nn.softmax(energy, axis=-1)          # (B, 1, 1) -> all ones
    ref = gamma[0] * jnp.einsum('bci,bji->bcj', xu, attention) + xu   # (B, C, 1)

    assert out.shape == (B, C, 1), out.shape
    assert jnp.allclose(out, ref, atol=1e-5, rtol=1e-5), (out, ref)
    print("KERNEL_OK")
</pallas_src>

<mosaic_0001>
module attributes {stable_mosaic.version = 11 : i64} {
  func.func @self_attention_kernel(%arg0: i32, %arg1: memref<1xf32, #tpu.memory_space<smem>>, %arg2: memref<8x128xf32, #tpu.memory_space<vmem>>, %arg3: memref<8x128xf32, #tpu.memory_space<vmem>>) attributes {dimension_semantics = [#tpu.dimension_semantics<parallel>], iteration_bounds = array<i64: 1>, scalar_prefetch = 0 : i64, scratch_operands = 0 : i64, tpu.core_type = #tpu.core_type<tc>, window_params = [{transform_indices = @transform_0, window_bounds = array<i64: 1>}, {transform_indices = @transform_1, window_bounds = array<i64: 8, 128>}, {transform_indices = @transform_2, window_bounds = array<i64: 8, 128>}]} {
    %c0 = arith.constant 0 : index
    %0 = memref.load %arg1[%c0] : memref<1xf32, #tpu.memory_space<smem>>
    %cst = arith.constant 1.000000e+00 : f32
    %1 = arith.addf %0, %cst : f32
    %c0_0 = arith.constant 0 : index
    %c0_1 = arith.constant 0 : index
    %2 = vector.load %arg2[%c0_0, %c0_1] : memref<8x128xf32, #tpu.memory_space<vmem>>, vector<8x128xf32>
    %3 = vector.broadcast %1 : f32 to vector<8x128xf32>
    %4 = arith.mulf %2, %3 : vector<8x128xf32>
    %c0_2 = arith.constant 0 : index
    %c0_3 = arith.constant 0 : index
    %5 = vector.load %arg3[%c0_2, %c0_3] : memref<8x128xf32, #tpu.memory_space<vmem>>, vector<8x128xf32>
    tpu.vector_store %arg3[%c0_2, %c0_3], %4 {strides = array<i32>} : memref<8x128xf32, #tpu.memory_space<vmem>>, vector<8x128xf32>,
    return
  }
  func.func @transform_0(%arg0: i32) -> i32 {
    %c0_i32 = arith.constant 0 : i32
    %c0_i32_0 = arith.constant 0 : i32
    return %c0_i32 : i32
  }
  func.func @transform_1(%arg0: i32) -> (i32, i32) {
    %c0_i32 = arith.constant 0 : i32
    %c0_i32_0 = arith.constant 0 : i32
    return %arg0, %c0_i32 : i32, i32
  }
  func.func @transform_2(%arg0: i32) -> (i32, i32) {
    %c0_i32 = arith.constant 0 : i32
    %c0_i32_0 = arith.constant 0 : i32
    return %arg0, %c0_i32 : i32, i32
  }
}

</mosaic_0001>

<bundles_post_ra>
// kernel: tpu_custom_call.1
= control target key start
LH: loop header
LB: loop body
LE: loop exit
PB: predicated region body
PF: predicated region fallthrough
CT: control target
= control target key end

     0   :  { %8 = vsyncpa [#allocation4], 0  ;;  %s140_s0 = inlined_call_operand.<no memory space> [shape: f32[1], index: 0, kind: input, shape index: {}]   ;;  %s141_s1 = inlined_call_operand.hbm [shape: f32[8,128], index: 1, kind: input, shape index: {}]   ;;  %s142_s2 = inlined_call_operand.hbm [shape: f32[8,128], index: 2, kind: output, shape index: {}]  }
   0x1   :  { %9 = vsyncpa [#allocation5], 0  ;;  %s96_s9 = smov [#allocation3]   ;;  %s48_s13 = scalar_lea.hbm %s141_s1, 128 }
   0x2   :  { %s18_s10 = sshll.u32 %s96_s9, 4  ;;  %p49_p0 = scmp.ne.s32.totalorder %s141_s1, %s48_s13  ;;  %s19_s10 = int_to_ptr.vmem [resolvable:$true] %s18_s10 }
   0x3   :  { %p52_p1 = scmp.lt.u32.totalorder %s48_s13, %s141_s1 }
   0x5   :  { %p54_p2 = pnand %p52_p1, %p49_p0 }
   0x7   :  { %57 = shalt.err (!%p54_p2)
}
   0x8   :  { %s58_s18 = scalar_lea.vmem %s19_s10, 128  ;;  %p63_p4 = scmp.lt.s32.totalorder %s19_s10, %s19_s10 }
   0x9   :  { %p59_p3 = scmp.ne.s32.totalorder %s19_s10, %s58_s18  ;;  %p64_p5 = scmp.lt.s32.totalorder %s58_s18, %s58_s18 }
   0xb   :  { %p65_p6 = por %p64_p5, %p63_p4 }
   0xd   :  { %p66_p7 = pnand %p65_p6, %p59_p3 }
   0xf   :  { %69 = shalt.err (!%p66_p7)
}
  0x10   :  { %21 = dma.hbm_to_vmem [thread:$0]  %s141_s1, 128, %s19_s10, [#allocation4]  }
  0x11   :  { %92 = dma.done.wait [#allocation4], 128  }
  0x12   :  { %93 = vsyncadd [#allocation4], 4294967168  ;;  %s26_s23 = sadd.f32 1.0, %s140_s0  ;;  %s97_s24 = smov [#allocation6]   ;;  %v27_v1 = vld [vmem:[#allocation3] sm:$0xff] }
  0x13   :  { %s37_s25 = sshll.u32 %s97_s24, 4  ;;  %s38_s25 = int_to_ptr.vmem [resolvable:$true] %s37_s25 }
  0x14   :  { %v28_v0 = vstv %s26_s23  ;;  %s70_s26 = scalar_lea.vmem %s38_s25, 128  ;;  %p75_p9 = scmp.lt.s32.totalorder %s38_s25, %s38_s25 }
  0x15   :  { %v29_v2 = vmul.f32 %v28_v0, %v27_v1  ;;  %p71_p8 = scmp.ne.s32.totalorder %s38_s25, %s70_s26  ;;  %p76_p10 = scmp.lt.s32.totalorder %s70_s26, %s70_s26 }
  0x17   :  { %30 = vst [vmem:[#allocation6] sm:$0xff] %v29_v2  ;;  %p77_p11 = por %p76_p10, %p75_p9 }
  0x19   :  { %p78_p12 = pnand %p77_p11, %p71_p8 }
  0x1b   :  { %81 = shalt.err (!%p78_p12)
}
  0x1c   :  { %s82_s28 = scalar_lea.hbm %s142_s2, 128 }
  0x1d   :  { %p83_p13 = scmp.ne.s32.totalorder %s142_s2, %s82_s28  ;;  %p86_p0 = scmp.lt.u32.totalorder %s82_s28, %s142_s2 }
  0x1f   :  { %p88_p1 = pnand %p86_p0, %p83_p13 }
  0x21   :  { %91 = shalt.err (!%p88_p1)
}
  0x22   :  { %40 = dma.vmem_to_hbm [thread:$0]  %s38_s25, 128, %s142_s2, [#allocation5]  }
  0x23   :  { %94 = dma.done.wait [#allocation5], 128  }
  0x24   :  { %95 = vsyncadd [#allocation5], 4294967168 }
  0x25   :  { %44 = vsyncpa [#allocation4], 1 }
  0x26   :  { %45 = vsyncpa [#allocation5], 1 }

</bundles_post_ra>
